<compile_context>
chip_gen: v7x
topology: tpu7x:2x2x1
jax: 0.10.0
libtpu: 0.0.40
codegen_flags: <defaults>
</compile_context>

<pallas_src>
import jax
import jax.numpy as jnp
import numpy as np
from jax import lax
from jax.experimental import pallas as pl
from jax.experimental.pallas import tpu as pltpu

_E_PAD = 128          # embed dim 100 -> 128 (lane-dense MXU tiles)
_H_PAD = 128          # hidden dim -> 128
_C_PAD = 128          # class dim  -> 128 (lane-dense output store, no vst.msk)
_GATHER_DEPTH = 8     # DMA slots for the HBM fallback (7 row copies in flight)
_VMEM_TABLE_BYTES = 8 * 1024 * 1024   # table-residency threshold; safe headroom
                                      # on v7x (64 MiB/TC) and v5e default limits
assert _GATHER_DEPTH & (_GATHER_DEPTH - 1) == 0


# --------------------------------------------------------------------------- #
# Kernels
# --------------------------------------------------------------------------- #
def _head(acc, w_ih_ref, b_h_ref, w_fc_ref, b_fc_ref, out_ref):
    """Single-step RNN (h0 == 0) + classifier on the bag-mean tile."""
    bag = acc[...]                                                   # [TB, 128]
    h = jnp.tanh(
        jnp.dot(bag, w_ih_ref[...], preferred_element_type=jnp.float32)
        + b_h_ref[...])                                              # [TB, 128]
    out_ref[...] = (
        jnp.dot(h, w_fc_ref[...], preferred_element_type=jnp.float32)
        + b_fc_ref[...])                                             # [TB, 128]


def _divide_by_counts(acc, offs_ref, base, bag_tile):
    """acc[lb] /= max(1, bag_len) for each bag in the tile (empty bags -> 0)."""
    def div_body(lb, carry):
        cnt = offs_ref[base + lb + 1] - offs_ref[base + lb]
        denom = jnp.maximum(cnt, 1).astype(jnp.float32)
        acc[pl.ds(lb, 1), :] = acc[pl.ds(lb, 1), :] / denom
        return carry
    lax.fori_loop(0, bag_tile, div_body, 0)


def _vmem_kernel(text_ref, bag_ref, offs_ref,                 # scalar prefetch (SMEM)
                 emb_ref, w_ih_ref, b_h_ref, w_fc_ref, b_fc_ref,   # VMEM inputs
                 out_ref,                                     # VMEM output tile
                 acc):                                        # scratch
    """Embedding table resident in VMEM; gather = dynamic indexed loads."""
    i = pl.program_id(0)
    bag_tile, _ = acc.shape
    base = i * bag_tile
    t_start = offs_ref[base]
    t_end = offs_ref[base + bag_tile]

    acc[...] = jnp.zeros_like(acc)

    # One flat token loop over the whole tile's token range.
    def tok_body(t, carry):
        lb = bag_ref[t] - base
        row = emb_ref[pl.ds(text_ref[t], 1), :]                     # [1, 128]
        acc[pl.ds(lb, 1), :] += row
        return carry
    lax.fori_loop(t_start, t_end, tok_body, 0)

    _divide_by_counts(acc, offs_ref, base, bag_tile)
    _head(acc, w_ih_ref, b_h_ref, w_fc_ref, b_fc_ref, out_ref)


def _hbm_kernel(text_ref, bag_ref, offs_ref,                  # scalar prefetch (SMEM)
                emb_hbm,                                      # HBM (pl.ANY)
                w_ih_ref, b_h_ref, w_fc_ref, b_fc_ref,        # VMEM weights
                out_ref,                                      # VMEM output tile
                row_buf, acc, sem):                           # scratch
    """Large-vocab fallback: deep-pipelined per-row DMA gather from HBM."""
    i = pl.program_id(0)
    bag_tile, _ = acc.shape
    depth = row_buf.shape[0]
    base = i * bag_tile
    t_start = offs_ref[base]
    t_end = offs_ref[base + bag_tile]

    acc[...] = jnp.zeros_like(acc)

    def start_row(t):
        slot = (t - t_start) & (depth - 1)
        pltpu.make_async_copy(emb_hbm.at[text_ref[t]], row_buf.at[slot],
                              sem.at[slot]).start()

    # Prime: keep depth-1 row copies in flight across the whole tile range
    # (the flat loop means the pipeline never drains at bag boundaries).
    for j in range(depth - 1):
        @pl.when(t_start + j < t_end)
        def _():
            start_row(t_start + j)

    def tok_body(t, carry):
        slot = (t - t_start) & (depth - 1)

        @pl.when(t + (depth - 1) < t_end)
        def _():                                   # refill the slot freed at t-1
            start_row(t + (depth - 1))

        pltpu.make_async_copy(emb_hbm.at[0], row_buf.at[slot], sem.at[slot]).wait()
        lb = bag_ref[t] - base
        acc[pl.ds(lb, 1), :] += row_buf[pl.ds(slot, 1), :]   # only the waited slot
        return carry

    lax.fori_loop(t_start, t_end, tok_body, 0)

    _divide_by_counts(acc, offs_ref, base, bag_tile)
    _head(acc, w_ih_ref, b_h_ref, w_fc_ref, b_fc_ref, out_ref)


# --------------------------------------------------------------------------- #
# Wrappers
# --------------------------------------------------------------------------- #
def prepare_params(emb, w_ih, b_ih, w_hh, b_hh, w_fc, b_fc):
    """One-time parameter repack (hoisted out of the forward path)."""
    V, E = emb.shape
    H = w_ih.shape[0]
    C = w_fc.shape[0]
    assert E == 100, "forward() reshapes to (batch, 1, 100) => embed_dim must be 100"
    # Module runs exactly one RNN step with h0 == 0, so w_hh contributes nothing;
    # only b_hh survives (fused into the hidden bias).
    del w_hh

    V_pad = ((V + 7) // 8) * 8
    emb_p = jnp.zeros((V_pad, _E_PAD), jnp.float32).at[:V, :E].set(emb.astype(jnp.float32))
    w_ih_p = jnp.zeros((_E_PAD, _H_PAD), jnp.float32).at[:E, :H].set(w_ih.T.astype(jnp.float32))
    b_h_p = jnp.zeros((1, _H_PAD), jnp.float32).at[0, :H].set((b_ih + b_hh).astype(jnp.float32))
    w_fc_p = jnp.zeros((_H_PAD, _C_PAD), jnp.float32).at[:H, :C].set(w_fc.T.astype(jnp.float32))
    b_fc_p = jnp.zeros((1, _C_PAD), jnp.float32).at[0, :C].set(b_fc.astype(jnp.float32))

    return dict(emb=emb_p, w_ih=w_ih_p, b_h=b_h_p, w_fc=w_fc_p, b_fc=b_fc_p,
                vocab=V, num_class=C)


def _pick_bag_tile(B, max_tile=64):
    """Biggest power-of-two tile (>=8) that still leaves >=2 grid steps when
    the batch allows it, so v7x can shard bag tiles across its 2 TensorCores."""
    tile = max_tile
    while tile > 8 and (B + tile - 1) // tile < 2:
        tile //= 2
    return tile


def rnn_sentiment_forward(text, offsets, params, *, max_bag_tile=64,
                          use_vmem_table=None):
    """Forward pass. `params` comes from prepare_params() (built once)."""
    T = int(text.shape[0])
    B = int(offsets.shape[0])
    V = params["vocab"]
    C = params["num_class"]
    emb_p = params["emb"]

    bag_tile = _pick_bag_tile(B, max_bag_tile)
    B_pad = ((B + bag_tile - 1) // bag_tile) * bag_tile
    grid = (B_pad // bag_tile,)

    # Per-call scalar-prefetch operands (cheap, O(T + B)).
    text_i32 = jnp.clip(text.astype(jnp.int32), 0, V - 1)
    offs = offsets.astype(jnp.int32)
    offs_ext = jnp.full((B_pad + 1,), T, jnp.int32).at[:B].set(offs)
    bag_ids = (jnp.searchsorted(offs, jnp.arange(T, dtype=jnp.int32),
                                side="right").astype(jnp.int32) - 1)

    if use_vmem_table is None:
        use_vmem_table = emb_p.size * 4 <= _VMEM_TABLE_BYTES

    # Constant-index (grid-invariant) operands: single buffer is enough.
    resident = dict(pipeline_mode=pl.Buffered(1))
    weight_specs = [
        pl.BlockSpec((_E_PAD, _H_PAD), lambda i, *_: (0, 0), **resident),  # w_ih^T
        pl.BlockSpec((1, _H_PAD), lambda i, *_: (0, 0), **resident),       # b_ih + b_hh
        pl.BlockSpec((_H_PAD, _C_PAD), lambda i, *_: (0, 0), **resident),  # w_fc^T
        pl.BlockSpec((1, _C_PAD), lambda i, *_: (0, 0), **resident),       # b_fc
    ]
    acc_scratch = pltpu.VMEM((bag_tile, _E_PAD), jnp.float32)

    if use_vmem_table:
        kernel = _vmem_kernel
        emb_spec = pl.BlockSpec(emb_p.shape, lambda i, *_: (0, 0), **resident)
        scratch = [acc_scratch]
    else:
        kernel = _hbm_kernel
        emb_spec = pl.BlockSpec(memory_space=pl.ANY)       # table stays in HBM
        scratch = [
            pltpu.VMEM((_GATHER_DEPTH, _E_PAD), jnp.float32),   # row-gather ring
            acc_scratch,
            pltpu.SemaphoreType.DMA((_GATHER_DEPTH,)),
        ]

    out_padded = pl.pallas_call(
        kernel,
        out_shape=jax.ShapeDtypeStruct((B_pad, _C_PAD), jnp.float32),
        grid_spec=pltpu.PrefetchScalarGridSpec(
            num_scalar_prefetch=3,
            grid=grid,
            in_specs=[emb_spec] + weight_specs,
            out_specs=pl.BlockSpec((bag_tile, _C_PAD), lambda i, *_: (i, 0)),
            scratch_shapes=scratch,
        ),
        compiler_params=pltpu.CompilerParams(
            dimension_semantics=("parallel",),   # shard bag tiles across TCs (v7x)
        ),
    )(text_i32, bag_ids, offs_ext,
      emb_p, params["w_ih"], params["b_h"], params["w_fc"], params["b_fc"])

    return out_padded[:B, :C]


# --------------------------------------------------------------------------- #
# Pure-JAX reference of the PyTorch forward pass
# --------------------------------------------------------------------------- #
def ref_forward(text, offsets, emb, w_ih, b_ih, w_hh, b_hh, w_fc, b_fc):
    T = text.shape[0]
    offsets_ext = np.concatenate([np.asarray(offsets), np.array([T])])
    tok = emb[text]                                                  # [T, E]
    bags = []
    for b in range(offsets.shape[0]):
        s, e = int(offsets_ext[b]), int(offsets_ext[b + 1])
        bags.append(tok[s:e].mean(axis=0))
    embedded = jnp.stack(bags)                                       # [B, E]
    h0 = jnp.zeros((embedded.shape[0], w_hh.shape[0]), jnp.float32)
    h = jnp.tanh(embedded @ w_ih.T + b_ih + h0 @ w_hh.T + b_hh)      # [B, H]
    return h @ w_fc.T + b_fc                                         # [B, C]


if __name__ == "__main__":
    # small shapes consistent with the module: embed_dim forced to 100 by the reshape
    V, E, H, C = 50, 100, 32, 4     # input_size, embed_dim, hidden_dim, num_class
    B, T = 2, 8                     # number of bags, total tokens

    key = jax.random.PRNGKey(0)
    ks = jax.random.split(key, 8)
    bound = 1.0 / np.sqrt(H)
    emb  = jax.random.normal(ks[0], (V, E), jnp.float32)
    w_ih = jax.random.uniform(ks[1], (H, E), jnp.float32, -bound, bound)
    w_hh = jax.random.uniform(ks[2], (H, H), jnp.float32, -bound, bound)
    b_ih = jax.random.uniform(ks[3], (H,),   jnp.float32, -bound, bound)
    b_hh = jax.random.uniform(ks[4], (H,),   jnp.float32, -bound, bound)
    w_fc = jax.random.uniform(ks[5], (C, H), jnp.float32, -bound, bound)
    b_fc = jax.random.uniform(ks[6], (C,),   jnp.float32, -bound, bound)

    text = jax.random.randint(ks[7], (T,), 0, V, jnp.int32)
    offsets = jnp.array([0, 5], jnp.int32)   # bag 0 -> tokens [0:5), bag 1 -> [5:8)

    params = prepare_params(emb, w_ih, b_ih, w_hh, b_hh, w_fc, b_fc)  # one-time repack
    ref = ref_forward(text, offsets, emb, w_ih, b_ih, w_hh, b_hh, w_fc, b_fc)

    # Main path: VMEM-resident embedding table (auto-selected for this vocab size).
    out_vmem = jax.block_until_ready(rnn_sentiment_forward(text, offsets, params))
    np.testing.assert_allclose(np.asarray(out_vmem), np.asarray(ref), rtol=1e-4, atol=1e-4)

    # Large-vocab fallback path: HBM table + deep-pipelined per-row DMA gather.
    out_hbm = jax.block_until_ready(
        rnn_sentiment_forward(text, offsets, params, use_vmem_table=False))
    np.testing.assert_allclose(np.asarray(out_hbm), np.asarray(ref), rtol=1e-4, atol=1e-4)

    print("KERNEL_OK")
</pallas_src>

<mosaic_0001>
module attributes {stable_mosaic.version = 11 : i64} {
  func.func @_vmem_kernel(%arg0: i32, %arg1: memref<8xi32, #tpu.memory_space<smem>>, %arg2: memref<8xi32, #tpu.memory_space<smem>>, %arg3: memref<9xi32, #tpu.memory_space<smem>>, %arg4: memref<56x128xf32, #tpu.memory_space<vmem>>, %arg5: memref<128x128xf32, #tpu.memory_space<vmem>>, %arg6: memref<1x128xf32, #tpu.memory_space<vmem>>, %arg7: memref<128x128xf32, #tpu.memory_space<vmem>>, %arg8: memref<1x128xf32, #tpu.memory_space<vmem>>, %arg9: memref<8x128xf32, #tpu.memory_space<vmem>>, %arg10: memref<8x128xf32, #tpu.memory_space<vmem>>) attributes {dimension_semantics = [#tpu.dimension_semantics<parallel>], iteration_bounds = array<i64: 1>, scalar_prefetch = 3 : i64, scratch_operands = 1 : i64, tpu.core_type = #tpu.core_type<tc>, window_params = [{pipeline_mode = #tpu.pipeline_mode<synchronous>, transform_indices = @transform_0, window_bounds = array<i64: 56, 128>}, {pipeline_mode = #tpu.pipeline_mode<synchronous>, transform_indices = @transform_1, window_bounds = array<i64: 128, 128>}, {pipeline_mode = #tpu.pipeline_mode<synchronous>, transform_indices = @transform_2, window_bounds = array<i64: 1, 128>}, {pipeline_mode = #tpu.pipeline_mode<synchronous>, transform_indices = @transform_3, window_bounds = array<i64: 128, 128>}, {pipeline_mode = #tpu.pipeline_mode<synchronous>, transform_indices = @transform_4, window_bounds = array<i64: 1, 128>}, {transform_indices = @transform_5, window_bounds = array<i64: 8, 128>}]} {
    %c8_i32 = arith.constant 8 : i32
    %0 = arith.muli %arg0, %c8_i32 : i32
    %1 = arith.index_cast %0 : i32 to index
    %2 = memref.load %arg3[%1] : memref<9xi32, #tpu.memory_space<smem>>
    %c8_i32_0 = arith.constant 8 : i32
    %3 = arith.addi %0, %c8_i32_0 : i32
    %4 = arith.index_cast %3 : i32 to index
    %5 = memref.load %arg3[%4] : memref<9xi32, #tpu.memory_space<smem>>
    %cst = arith.constant 0.000000e+00 : f32
    %6 = vector.broadcast %cst : f32 to vector<8x128xf32>
    %c0 = arith.constant 0 : index
    %c0_1 = arith.constant 0 : index
    %7 = vector.load %arg10[%c0, %c0_1] : memref<8x128xf32, #tpu.memory_space<vmem>>, vector<8x128xf32>
    tpu.vector_store %arg10[%c0, %c0_1], %6 {strides = array<i32>} : memref<8x128xf32, #tpu.memory_space<vmem>>, vector<8x128xf32>,
    %c0_i32 = arith.constant 0 : i32
    %8 = arith.subi %5, %2 : i32
    %9 = arith.addi %2, %8 : i32
    %c1_i32 = arith.constant 1 : i32
    scf.for %arg11 = %2 to %9 step %c1_i32  : i32 {
      %24 = arith.index_cast %arg11 : i32 to index
      %25 = memref.load %arg2[%24] : memref<8xi32, #tpu.memory_space<smem>>
      %26 = arith.subi %25, %0 : i32
      %27 = arith.index_cast %arg11 : i32 to index
      %28 = memref.load %arg1[%27] : memref<8xi32, #tpu.memory_space<smem>>
      %29 = arith.index_cast %28 : i32 to index
      %c0_20 = arith.constant 0 : index
      %30 = vector.load %arg4[%29, %c0_20] : memref<56x128xf32, #tpu.memory_space<vmem>>, vector<1x128xf32>
      %31 = arith.index_cast %26 : i32 to index
      %c0_21 = arith.constant 0 : index
      %32 = vector.load %arg10[%31, %c0_21] : memref<8x128xf32, #tpu.memory_space<vmem>>, vector<1x128xf32>
      %33 = arith.addf %32, %30 : vector<1x128xf32>
      %34 = arith.index_cast %26 : i32 to index
      %c0_22 = arith.constant 0 : index
      %35 = vector.load %arg10[%34, %c0_22] : memref<8x128xf32, #tpu.memory_space<vmem>>, vector<1x128xf32>
      tpu.vector_store %arg10[%34, %c0_22], %33 {strides = array<i32>} : memref<8x128xf32, #tpu.memory_space<vmem>>, vector<1x128xf32>,
    }
    %c0_i32_2 = arith.constant 0 : i32
    %c8_i32_3 = arith.constant 8 : i32
    %10 = arith.addi %c0_i32_2, %c8_i32_3 : i32
    %c1_i32_4 = arith.constant 1 : i32
    scf.for %arg11 = %c0_i32_2 to %10 step %c1_i32_4  : i32 {
      %24 = arith.addi %0, %arg11 : i32
      %c1_i32_20 = arith.constant 1 : i32
      %25 = arith.addi %24, %c1_i32_20 : i32
      %26 = arith.index_cast %25 : i32 to index
      %27 = memref.load %arg3[%26] : memref<9xi32, #tpu.memory_space<smem>>
      %28 = arith.addi %0, %arg11 : i32
      %29 = arith.index_cast %28 : i32 to index
      %30 = memref.load %arg3[%29] : memref<9xi32, #tpu.memory_space<smem>>
      %31 = arith.subi %27, %30 : i32
      %c1_i32_21 = arith.constant 1 : i32
      %32 = arith.maxsi %31, %c1_i32_21 : i32
      %33 = arith.sitofp %32 : i32 to f32
      %34 = arith.index_cast %arg11 : i32 to index
      %c0_22 = arith.constant 0 : index
      %35 = vector.load %arg10[%34, %c0_22] : memref<8x128xf32, #tpu.memory_space<vmem>>, vector<1x128xf32>
      %36 = vector.broadcast %33 : f32 to vector<1x128xf32>
      %37 = arith.divf %35, %36 : vector<1x128xf32>
      %38 = arith.index_cast %arg11 : i32 to index
      %c0_23 = arith.constant 0 : index
      %39 = vector.load %arg10[%38, %c0_23] : memref<8x128xf32, #tpu.memory_space<vmem>>, vector<1x128xf32>
      tpu.vector_store %arg10[%38, %c0_23], %37 {strides = array<i32>} : memref<8x128xf32, #tpu.memory_space<vmem>>, vector<1x128xf32>,
    }
    %c8_i32_5 = arith.constant 8 : i32
    %c0_6 = arith.constant 0 : index
    %c0_7 = arith.constant 0 : index
    %11 = vector.load %arg10[%c0_6, %c0_7] : memref<8x128xf32, #tpu.memory_space<vmem>>, vector<8x128xf32>
    %c0_8 = arith.constant 0 : index
    %c0_9 = arith.constant 0 : index
    %12 = vector.load %arg5[%c0_8, %c0_9] : memref<128x128xf32, #tpu.memory_space<vmem>>, vector<128x128xf32>
    %cst_10 = arith.constant dense<0.000000e+00> : vector<8x128xf32>
    %13 = tpu.matmul %11, %12, %cst_10 {dimension_numbers = #tpu.dot_dimension_numbers<[1], [0], [0], [1], [0, 0, 1, 1], [], []>} : vector<8x128xf32>, vector<128x128xf32>, vector<8x128xf32> -> vector<8x128xf32>
    %c0_11 = arith.constant 0 : index
    %c0_12 = arith.constant 0 : index
    %14 = vector.load %arg6[%c0_11, %c0_12] : memref<1x128xf32, #tpu.memory_space<vmem>>, vector<1x128xf32>
    %15 = vector.broadcast %14 : vector<1x128xf32> to vector<8x128xf32>
    %16 = arith.addf %13, %15 : vector<8x128xf32>
    %17 = math.tanh %16 : vector<8x128xf32>
    %c0_13 = arith.constant 0 : index
    %c0_14 = arith.constant 0 : index
    %18 = vector.load %arg7[%c0_13, %c0_14] : memref<128x128xf32, #tpu.memory_space<vmem>>, vector<128x128xf32>
    %cst_15 = arith.constant dense<0.000000e+00> : vector<8x128xf32>
    %19 = tpu.matmul %17, %18, %cst_15 {dimension_numbers = #tpu.dot_dimension_numbers<[1], [0], [0], [1], [0, 0, 1, 1], [], []>} : vector<8x128xf32>, vector<128x128xf32>, vector<8x128xf32> -> vector<8x128xf32>
    %c0_16 = arith.constant 0 : index
    %c0_17 = arith.constant 0 : index
    %20 = vector.load %arg8[%c0_16, %c0_17] : memref<1x128xf32, #tpu.memory_space<vmem>>, vector<1x128xf32>
    %21 = vector.broadcast %20 : vector<1x128xf32> to vector<8x128xf32>
    %22 = arith.addf %19, %21 : vector<8x128xf32>
    %c0_18 = arith.constant 0 : index
    %c0_19 = arith.constant 0 : index
    %23 = vector.load %arg9[%c0_18, %c0_19] : memref<8x128xf32, #tpu.memory_space<vmem>>, vector<8x128xf32>
    tpu.vector_store %arg9[%c0_18, %c0_19], %22 {strides = array<i32>} : memref<8x128xf32, #tpu.memory_space<vmem>>, vector<8x128xf32>,
    return
  }
  func.func @transform_0(%arg0: i32, %arg1: memref<8xi32, #tpu.memory_space<smem>>, %arg2: memref<8xi32, #tpu.memory_space<smem>>, %arg3: memref<9xi32, #tpu.memory_space<smem>>) -> (i32, i32) {
    %c0_i32 = arith.constant 0 : i32
    %c0_i32_0 = arith.constant 0 : i32
    %c0_i32_1 = arith.constant 0 : i32
    return %c0_i32, %c0_i32_0 : i32, i32
  }
  func.func @transform_1(%arg0: i32, %arg1: memref<8xi32, #tpu.memory_space<smem>>, %arg2: memref<8xi32, #tpu.memory_space<smem>>, %arg3: memref<9xi32, #tpu.memory_space<smem>>) -> (i32, i32) {
    %c0_i32 = arith.constant 0 : i32
    %c0_i32_0 = arith.constant 0 : i32
    %c0_i32_1 = arith.constant 0 : i32
    return %c0_i32, %c0_i32_0 : i32, i32
  }
  func.func @transform_2(%arg0: i32, %arg1: memref<8xi32, #tpu.memory_space<smem>>, %arg2: memref<8xi32, #tpu.memory_space<smem>>, %arg3: memref<9xi32, #tpu.memory_space<smem>>) -> (i32, i32) {
    %c0_i32 = arith.constant 0 : i32
    %c0_i32_0 = arith.constant 0 : i32
    %c0_i32_1 = arith.constant 0 : i32
    return %c0_i32, %c0_i32_0 : i32, i32
  }
  func.func @transform_3(%arg0: i32, %arg1: memref<8xi32, #tpu.memory_space<smem>>, %arg2: memref<8xi32, #tpu.memory_space<smem>>, %arg3: memref<9xi32, #tpu.memory_space<smem>>) -> (i32, i32) {
    %c0_i32 = arith.constant 0 : i32
    %c0_i32_0 = arith.constant 0 : i32
    %c0_i32_1 = arith.constant 0 : i32
    return %c0_i32, %c0_i32_0 : i32, i32
  }
  func.func @transform_4(%arg0: i32, %arg1: memref<8xi32, #tpu.memory_space<smem>>, %arg2: memref<8xi32, #tpu.memory_space<smem>>, %arg3: memref<9xi32, #tpu.memory_space<smem>>) -> (i32, i32) {
    %c0_i32 = arith.constant 0 : i32
    %c0_i32_0 = arith.constant 0 : i32
    %c0_i32_1 = arith.constant 0 : i32
    return %c0_i32, %c0_i32_0 : i32, i32
  }
  func.func @transform_5(%arg0: i32, %arg1: memref<8xi32, #tpu.memory_space<smem>>, %arg2: memref<8xi32, #tpu.memory_space<smem>>, %arg3: memref<9xi32, #tpu.memory_space<smem>>) -> (i32, i32) {
    %c0_i32 = arith.constant 0 : i32
    %c0_i32_0 = arith.constant 0 : i32
    return %arg0, %c0_i32 : i32, i32
  }
}

</mosaic_0001>

<bundles_post_ra>
// kernel: tpu_custom_call.1
= control target key start
LH: loop header
LB: loop body
LE: loop exit
PB: predicated region body
PF: predicated region fallthrough
CT: control target
= control target key end

     0   :  { %s829_s0 = inlined_call_operand.hbm [shape: s32[8], index: 0, kind: input, shape index: {}]   ;;  %s830_s3 = inlined_call_operand.hbm [shape: f32[56,128], index: 3, kind: input, shape index: {}]   ;;  %s831_s4 = inlined_call_operand.hbm [shape: f32[128,128], index: 4, kind: input, shape index: {}]   ;;  %s832_s5 = inlined_call_operand.vmem [shape: f32[1,128], index: 5, kind: input, shape index: {}]   ;;  %s833_s6 = inlined_call_operand.hbm [shape: f32[128,128], index: 6, kind: input, shape index: {}]   ;;  %s834_s7 = inlined_call_operand.vmem [shape: f32[1,128], index: 7, kind: input, shape index: {}]   ;;  %s835_s8 = inlined_call_operand.hbm [shape: f32[8,128], index: 8, kind: output, shape index: {}]   ;;  %s836_s1 = inlined_call_operand.vmem [shape: s32[8], index: 1, kind: input, shape index: {}]   ;;  %s837_s2 = inlined_call_operand.vmem [shape: s32[9], index: 2, kind: input, shape index: {}]  }
   0x1   :  { %s522_s29 = scalar_lea.hbm %s829_s0, 16 }
   0x2   :  { %p523_p0 = scmp.ne.s32.totalorder %s829_s0, %s522_s29  ;;  %p526_p1 = scmp.lt.u32.totalorder %s522_s29, %s829_s0 }
   0x4   :  { %p528_p2 = pnand %p526_p1, %p523_p0 }
   0x6   :  { %531 = shalt.err (!%p528_p2)  }
   0x7   :  { %s668_s12 = smov [#allocation4]   ;;  %s15_s17 = sshll.u32 %s836_s1, 4  ;;  %s16_s17 = int_to_ptr.vmem [resolvable:$true] %s15_s17 }
   0x8   :  { %14 = dma.hbm_to_smem %s829_s0, 16, %s668_s12, [#allocation3] }
   0x9   :  { %s19_s20 = sshll.u32 %s837_s2, 4  ;;  %s532_s21 = scalar_lea.vmem %s16_s17, 16  ;;  %s20_s20 = int_to_ptr.vmem [resolvable:$true] %s19_s20 }
   0xa   :  { %p533_p3 = scmp.ne.s32.totalorder %s16_s17, %s532_s21  ;;  %p537_p4 = scmp.lt.s32.totalorder %s16_s17, %s16_s17 }
   0xb   :  { %p538_p5 = scmp.lt.s32.totalorder %s532_s21, %s532_s21 }
   0xd   :  { %p539_p6 = por %p538_p5, %p537_p4 }
   0xf   :  { %p540_p7 = pnand %p539_p6, %p533_p3 }
  0x11   :  { %543 = shalt.err (!%p540_p7)  }
  0x12   :  { %s669_s22 = smov [#allocation5]   ;;  %s544_s0 = scalar_lea.vmem %s20_s20, 16 }
  0x13   :  { %18 = dma.vmem_to_smem %s16_s17, 16, %s669_s22, [#allocation3] }
  0x14   :  { %p545_p8 = scmp.ne.s32.totalorder %s20_s20, %s544_s0  ;;  %p549_p9 = scmp.lt.s32.totalorder %s20_s20, %s20_s20 }
  0x15   :  { %p550_p10 = scmp.lt.s32.totalorder %s544_s0, %s544_s0 }
  0x17   :  { %p551_p11 = por %p550_p10, %p549_p9 }
  0x19   :  { %p552_p12 = pnand %p551_p11, %p545_p8 }
  0x1b   :  { %555 = shalt.err (!%p552_p12)  }
  0x1c   :  { %s670_s1 = smov [#allocation6]  }
  0x1d   :  { %22 = dma.vmem_to_smem %s20_s20, 16, %s670_s1, [#allocation3] }
  0x1e   :  { %652 = dma.done.wait [#allocation3], 48 }
  0x1f   :  { %653 = vsyncadd [#allocation3], 4294967248 }
  0x20   :  { %24 = sfence }
  0x21   :  { %25 = vsyncpa [#allocation8], 0 }
  0x22   :  { %26 = vsyncpa [#allocation11], 0 }
  0x23   :  { %27 = vsyncpa [#allocation9], 0  ;;  %s671_s2 = smov [#allocation10]   ;;  %s672_s24 = smov [#allocation7]  }
  0x24   :  { %s45_s23 = sshll.u32 %s671_s2, 4  ;;  %s33_s25 = sshll.u32 %s672_s24, 4  ;;  %s46_s23 = int_to_ptr.vmem [resolvable:$true] %s45_s23  ;;  %s743_s25 = int_to_ptr.vmem [resolvable:$true] %s33_s25 }
  0x25   :  { %s556_s28 = scalar_lea.hbm %s831_s4, 2048 }
  0x26   :  { %p557_p13 = scmp.ne.s32.totalorder %s831_s4, %s556_s28  ;;  %p560_p0 = scmp.lt.u32.totalorder %s556_s28, %s831_s4 }
  0x28   :  { %p562_p1 = pnand %p560_p0, %p557_p13 }
  0x2a   :  { %565 = shalt.err (!%p562_p1)
}
  0x2b   :  { %s566_s11 = scalar_lea.vmem %s46_s23, 2048  ;;  %p571_p3 = scmp.lt.s32.totalorder %s46_s23, %s46_s23 }
  0x2c   :  { %p567_p2 = scmp.ne.s32.totalorder %s46_s23, %s566_s11  ;;  %p572_p4 = scmp.lt.s32.totalorder %s566_s11, %s566_s11 }
  0x2e   :  { %p573_p5 = por %p572_p4, %p571_p3 }
  0x30   :  { %p574_p6 = pnand %p573_p5, %p567_p2 }
  0x32   :  { %577 = shalt.err (!%p574_p6)
}
  0x33   :  { %s673_s12 = smov 128   ;;  %s674_s13 = smov 8  }
  0x34   :  { %51 = dma.hbm_to_vmem [thread:$0]  %s831_s4, 2048, %s46_s23, [#allocation11], %s673_s12, %s673_s12, %s674_s13  }
  0x35   :  { %s578_s18 = scalar_lea.hbm %s830_s3, 896 }
  0x36   :  { %p579_p7 = scmp.ne.s32.totalorder %s830_s3, %s578_s18  ;;  %p582_p8 = scmp.lt.u32.totalorder %s578_s18, %s830_s3 }
  0x38   :  { %p584_p9 = pnand %p582_p8, %p579_p7 }
  0x3a   :  { %587 = shalt.err (!%p584_p9)
}
  0x3b   :  { %s588_s0 = scalar_lea.vmem %s743_s25, 896  ;;  %p593_p11 = scmp.lt.s32.totalorder %s743_s25, %s743_s25 }
  0x3c   :  { %p589_p10 = scmp.ne.s32.totalorder %s743_s25, %s588_s0  ;;  %p594_p12 = scmp.lt.s32.totalorder %s588_s0, %s588_s0 }
  0x3e   :  { %p595_p13 = por %p594_p12, %p593_p11 }
  0x40   :  { %p596_p0 = pnand %p595_p13, %p589_p10 }
  0x42   :  { %599 = shalt.err (!%p596_p0)
}
  0x43   :  { %39 = dma.hbm_to_vmem [thread:$0]  %s830_s3, 896, %s743_s25, [#allocation8], %s673_s12, %s673_s12, %s674_s13  }
  0x44   :  { %s675_s2 = smov [#allocation12]   ;;  %s600_s27 = scalar_lea.hbm %s833_s6, 2048 }
  0x45   :  { %s59_s23 = sshll.u32 %s675_s2, 4  ;;  %p601_p1 = scmp.ne.s32.totalorder %s833_s6, %s600_s27  ;;  %s60_s23 = int_to_ptr.vmem [resolvable:$true] %s59_s23 }
  0x46   :  { %p604_p2 = scmp.lt.u32.totalorder %s600_s27, %s833_s6 }
  0x48   :  { %p606_p3 = pnand %p604_p2, %p601_p1 }
  0x4a   :  { %609 = shalt.err (!%p606_p3)
}
  0x4b   :  { %s610_s10 = scalar_lea.vmem %s60_s23, 2048  ;;  %p615_p5 = scmp.lt.s32.totalorder %s60_s23, %s60_s23 }
  0x4c   :  { %p611_p4 = scmp.ne.s32.totalorder %s60_s23, %s610_s10  ;;  %p616_p6 = scmp.lt.s32.totalorder %s610_s10, %s610_s10 }
  0x4e   :  { %p617_p7 = por %p616_p6, %p615_p5 }
  0x50   :  { %p618_p8 = pnand %p617_p7, %p611_p4 }
  0x52   :  { %621 = shalt.err (!%p618_p8)
}
  0x53   :  { %65 = dma.hbm_to_vmem [thread:$0]  %s833_s6, 2048, %s60_s23, [#allocation11], %s673_s12, %s673_s12, %s674_s13  }
  0x54   :  { %654 = dma.done.wait [#allocation8], 896  }
  0x55   :  { %655 = vsyncadd [#allocation8], 4294966400 }
  0x56   :  { %656 = dma.done.wait [#allocation11], 4096  }
  0x57   :  { %657 = vsyncadd [#allocation11], 4294963200  ;;  %s78_s11 = sld [smem:[#allocation6]]   ;;  %v676_v0 = vmov 0.0  }
  0x58   :  { %s335_s14 = sld [smem:[#allocation6 + $0x8]]  ;;  %81 = vst [vmem:[#allocation2] sm:$0xff] %v676_v0 }
  0x5e   :  { %p326_p9 = scmp.ge.s32.totalorder %s78_s11, %s335_s14 }
  0x5f   :  { %s660_s15 = smov (!%p326_p9), %s78_s11  }
  0x60   :  { %327 = sbr.rel (%p326_p9) target bundleno = 115 (0x73), region = 63 }
  0x67 LB: > { %s88_s16 = sld [smem:[#allocation5 + %s662_s15]]  ;;  %s662_s15 = sphi %s660_s15, %s85_s15  }
  0x68   : > { %s90_s17 = sld [smem:[#allocation4 + %s662_s15]]  ;;  %s85_s15 = sadd.s32 1, %s662_s15  }
  0x69   : > { %p84_p10 = scmp.ge.s32.totalorder %s85_s15, %s335_s14 }
  0x6c   :  { %87 = sbr.rel (!%p84_p10) target bundleno = 103 (0x67), region = 69 }
  0x6d   : > { %s93_s19 = scalar_lea.vmem [#allocation2], %s88_s16 }
  0x6e   : > { %s91_s18 = scalar_lea.vmem [#allocation7], %s90_s17  ;;  %v94_v2 = vld [vmem:[%s93_s19] sm:$0x1] }
  0x6f   : > { %v92_v1 = vld [vmem:[%s91_s18] sm:$0x1] }
  0x70   : > { %v95_v3 = vadd.f32 %v94_v2, %v92_v1 }
  0x72   : > { %96 = vst [vmem:[%s93_s19] sm:$0x1] %v95_v3 }
  0x73 PF:  { %s664_s6 = smov 0  }
  0x74 LB: > { %s104_s12 = sadd.s32 1, %s666_s6   ;;  %s106_s13 = sld [smem:[#allocation6 + %s666_s6]]  ;;  %s666_s6 = sphi %s664_s6, %s665_s6  }
  0x75   : > { %s105_s20 = sld [smem:[#allocation6 + %s104_s12]]  ;;  %s111_s0 = scalar_lea.vmem [#allocation2], %s666_s6 }
  0x76   : > { %p99_p12 = scmp.ge.s32.totalorder %s104_s12, 8   ;;  %s665_s6 = smov %s104_s12  }
  0x77   :  { %v118_v8 = vld [vmem:[#allocation10] sm:$0xff] (%p99_p12)  ;;  %v119_v9 = vld [vmem:[#allocation10 + $0x8] sm:$0xff] (%p99_p12)  ;;  %v120_v10 = vld [vmem:[#allocation10 + $0x10] sm:$0xff] (%p99_p12)  ;;  %v677_v11 = vmov (%p99_p12), 0.0|0.0   ;;  %vm678_vm0 = vmmov (%p99_p12), 0   ;;  %s679_s24 = smov (%p99_p12), [#allocation13]  }
  0x78   :  { %442 = vmatprep.subr.bf16.mxu0 (%p99_p12), %v677_v11  ;;  %v443_v12 = vpack.c.bf16 (%p99_p12), %v119_v9, %v118_v8  ;;  %v121_v13 = vld [vmem:[#allocation10 + $0x18] sm:$0xff] (%p99_p12)  ;;  %404 = vmatprep.mubr.msk.f32.mxu0 (%p99_p12), %vm678_vm0, %v676_v0  ;;  %v122_v15 = vld [vmem:[#allocation10 + $0x20] sm:$0xff] (%p99_p12)  ;;  %v123_v16 = vld [vmem:[#allocation10 + $0x28] sm:$0xff] (%p99_p12)  ;;  %s312_s26 = sshll.u32 (%p99_p12), %s679_s24, 4  ;;  %s313_s26 = int_to_ptr.vmem [resolvable:$true] %s312_s26 }
  0x79   : > { %v112_v5 = vld [vmem:[%s111_s0] sm:$0x1]  ;;  %466 = vmatprep.subr.bf16.mxu1 (%p99_p12), %v677_v11  ;;  %439 = vmatprep.mubr.msk.f32.mxu1 (%p99_p12), %vm678_vm0, %v676_v0  ;;  %v446_v14 = vpack.c.bf16 (%p99_p12), %v121_v13, %v120_v10  ;;  %v213_v18 = vld [vmem:[#allocation12 + $0x8] sm:$0xff] (%p99_p12)  ;;  %v214_v19 = vld [vmem:[#allocation12 + $0x10] sm:$0xff] (%p99_p12)  ;;  %v449_v21 = vpack.c.bf16 (%p99_p12), %v123_v16, %v122_v15  ;;  %s622_s27 = scalar_lea.vmem (%p99_p12), %s313_s26, 128  ;;  %p627_p0 = scmp.lt.s32.totalorder (%p99_p12), %s313_s26, %s313_s26 }
  0x7a   :  { %444 = vmatpush3.bf16.msra.mxu0 (%p99_p12), %v443_v12  ;;  %v212_v17 = vld [vmem:[#allocation12] sm:$0xff] (%p99_p12)  ;;  %v215_v20 = vld [vmem:[#allocation12 + $0x18] sm:$0xff] (%p99_p12)  ;;  %v124_v23 = vld [vmem:[#allocation10 + $0x30] sm:$0xff] (%p99_p12)  ;;  %p623_p13 = scmp.ne.s32.totalorder (%p99_p12), %s313_s26, %s622_s27  ;;  %p628_p1 = scmp.lt.s32.totalorder (%p99_p12), %s622_s27, %s622_s27 }
  0x7b   : > { %s107_s21 = ssub.s32 %s105_s20, %s106_s13  ;;  %445 = vmatprep.subr.bf16.mxu0 (%p99_p12), %v677_v11  ;;  %v467_v22 = vpack.c.bf16 (%p99_p12), %v213_v18, %v212_v17  ;;  %v125_v24 = vld [vmem:[#allocation10 + $0x38] sm:$0xff] (%p99_p12)  ;;  %v470_v25 = vpack.c.bf16 (%p99_p12), %v215_v20, %v214_v19  ;;  %v216_v26 = vld [vmem:[#allocation12 + $0x20] sm:$0xff] (%p99_p12)  ;;  %v217_v27 = vld [vmem:[#allocation12 + $0x28] sm:$0xff] (%p99_p12) }
  0x7c   : > { %p108_p11 = scmp.gt.s32.totalorder %s107_s21, 1  ;;  %v452_v28 = vpack.c.bf16 (%p99_p12), %v125_v24, %v124_v23  ;;  %v126_v29 = vld [vmem:[#allocation10 + $0x40] sm:$0xff] (%p99_p12)  ;;  %v127_v30 = vld [vmem:[#allocation10 + $0x48] sm:$0xff] (%p99_p12)  ;;  %v473_v31 = vpack.c.bf16 (%p99_p12), %v217_v27, %v216_v26  ;;  %v218_v32 = vld [vmem:[#allocation12 + $0x30] sm:$0xff] (%p99_p12)  ;;  %p629_p2 = por (%p99_p12), %p628_p1, %p627_p0 }
  0x7d   :  { %468 = vmatpush3.bf16.msra.mxu1 (%p99_p12), %v467_v22  ;;  %v219_v33 = vld [vmem:[#allocation12 + $0x38] sm:$0xff] (%p99_p12)  ;;  %v455_v34 = vpack.c.bf16 (%p99_p12), %v127_v30, %v126_v29  ;;  %v128_v35 = vld [vmem:[#allocation10 + $0x50] sm:$0xff] (%p99_p12)  ;;  %v220_v38 = vld [vmem:[#allocation12 + $0x40] sm:$0xff] (%p99_p12) }
  0x7e   : > { %s839_s21 = smov (!%p108_p11, %s107_s21), 1  ;;  %447 = vmatpush3.bf16.msra.mxu0 (%p99_p12), %v446_v14  ;;  %469 = vmatprep.subr.bf16.mxu1 (%p99_p12), %v677_v11  ;;  %v129_v36 = vld [vmem:[#allocation10 + $0x58] sm:$0xff] (%p99_p12)  ;;  %v476_v37 = vpack.c.bf16 (%p99_p12), %v219_v33, %v218_v32  ;;  %v221_v39 = vld [vmem:[#allocation12 + $0x48] sm:$0xff] (%p99_p12)  ;;  %v130_v41 = vld [vmem:[#allocation10 + $0x60] sm:$0xff] (%p99_p12)  ;;  %p630_p3 = pnand (%p99_p12), %p629_p2, %p623_p13 }
  0x7f   : > { %s110_s22 = scvt.s32.f32 %s839_s21  ;;  %448 = vmatprep.subr.bf16.mxu0 (%p99_p12), %v677_v11  ;;  %v458_v40 = vpack.c.bf16 (%p99_p12), %v129_v36, %v128_v35  ;;  %v131_v42 = vld [vmem:[#allocation10 + $0x68] sm:$0xff] (%p99_p12)  ;;  %v479_v43 = vpack.c.bf16 (%p99_p12), %v221_v39, %v220_v38  ;;  %v132_v45 = vld [vmem:[#allocation10 + $0x70] sm:$0xff] (%p99_p12)  ;;  %v133_v46 = vld [vmem:[#allocation10 + $0x78] sm:$0xff] (%p99_p12) }
  0x80   :  { %v461_v44 = vpack.c.bf16 (%p99_p12), %v131_v42, %v130_v41  ;;  %v464_v47 = vpack.c.bf16 (%p99_p12), %v133_v46, %v132_v45  ;;  %v222_v49 = vld [vmem:[#allocation12 + $0x50] sm:$0xff] (%p99_p12)  ;;  %v223_v50 = vld [vmem:[#allocation12 + $0x58] sm:$0xff] (%p99_p12)  ;;  %v224_v52 = vld [vmem:[#allocation12 + $0x60] sm:$0xff] (%p99_p12) }
  0x81   : > { %v113_v4 = vstv %s110_s22  ;;  %471 = vmatpush3.bf16.msra.mxu1 (%p99_p12), %v470_v25  ;;  %v482_v51 = vpack.c.bf16 (%p99_p12), %v223_v50, %v222_v49  ;;  %v225_v53 = vld [vmem:[#allocation12 + $0x68] sm:$0xff] (%p99_p12)  ;;  %v226_v55 = vld [vmem:[#allocation12 + $0x70] sm:$0xff] (%p99_p12)  ;;  %v227_v56 = vld [vmem:[#allocation12 + $0x78] sm:$0xff] (%p99_p12) }
  0x82   : > { %518 = vrcp.f32 %v113_v4  ;;  %450 = vmatpush3.bf16.msra.mxu0 (%p99_p12), %v449_v21  ;;  %472 = vmatprep.subr.bf16.mxu1 (%p99_p12), %v677_v11  ;;  %v485_v54 = vpack.c.bf16 (%p99_p12), %v225_v53, %v224_v52  ;;  %v488_v57 = vpack.c.bf16 (%p99_p12), %v227_v56, %v226_v55  ;;  %v336_v58 = vld [vmem:[%s832_s5] ss:$0 sm:$0xff] (%p99_p12) }
  0x83   :  { %451 = vmatprep.subr.bf16.mxu0 (%p99_p12), %v677_v11  ;;  %v337_v63 = vld [vmem:[%s834_s7] ss:$0 sm:$0xff] (%p99_p12) }
  0x85   :  { %474 = vmatpush3.bf16.msra.mxu1 (%p99_p12), %v473_v31 }
  0x86   :  { %453 = vmatpush3.bf16.msra.mxu0 (%p99_p12), %v452_v28  ;;  %475 = vmatprep.subr.bf16.mxu1 (%p99_p12), %v677_v11 }
  0x87   :  { %454 = vmatprep.subr.bf16.mxu0 (%p99_p12), %v677_v11 }
  0x89   :  { %101 = sbr.rel (!%p99_p12) target bundleno = 116 (0x74), region = 80  ;;  %477 = vmatpush3.bf16.msra.mxu1 (%p99_p12), %v476_v37 }
  0x8a   :  { %456 = vmatpush3.bf16.msra.mxu0 (%p99_p12), %v455_v34  ;;  %478 = vmatprep.subr.bf16.mxu1 (%p99_p12), %v677_v11 }
  0x8b   :  { %457 = vmatprep.subr.bf16.mxu0 (%p99_p12), %v677_v11 }
  0x8c   : > { %v519_v6 = vpop.eup %518 }
  0x8d   : > { %v115_v7 = vmul.f32 %v519_v6, %v112_v5  ;;  %480 = vmatpush3.bf16.msra.mxu1 (%p99_p12), %v479_v43 }
  0x8e   :  { %459 = vmatpush3.bf16.msra.mxu0 (%p99_p12), %v458_v40  ;;  %481 = vmatprep.subr.bf16.mxu1 (%p99_p12), %v677_v11 }
  0x8f   : > { %116 = vst [vmem:[%s111_s0] sm:$0x1] %v115_v7  ;;  %460 = vmatprep.subr.bf16.mxu0 (%p99_p12), %v677_v11 }
  0x91   :  { %483 = vmatpush3.bf16.msra.mxu1 %v482_v51 }
  0x92   :  { %462 = vmatpush3.bf16.msra.mxu0 %v461_v44  ;;  %484 = vmatprep.subr.bf16.mxu1 %v677_v11 }
  0x93   :  { %463 = vmatprep.subr.bf16.mxu0 %v677_v11 }
  0x95   :  { %486 = vmatpush3.bf16.msra.mxu1 %v485_v54 }
  0x96   :  { %465 = vmatpush3.bf16.msra.mxu0 %v464_v47  ;;  %v117_v48 = vld [vmem:[#allocation2] sm:$0xff]  ;;  %487 = vmatprep.subr.bf16.mxu1 %v677_v11 }
  0x99   :  { %405 = vmatmul.mubr.f32.vlgmr.msra.gmra.mrb[0].mxu0 %v117_v48  ;;  %489 = vmatpush3.bf16.msra.mxu1 %v488_v57 }
 0x16c   :  { %v207_v59 = vpop.f32.mrb[0].mxu0 }
 0x16d   :  { %v208_v60 = vadd.f32 %v336_v58, %v207_v59  ;;  %v406_v61 = vpop.f32.mrb[1].mxu0 }
 0x16f   :  { %520 = vtanh.f32 %v208_v60 }
 0x179   :  { %v521_v62 = vpop.eup %520 }
 0x17a   :  { %440 = vmatmul.mubr.f32.vlgmr.msra.gmra.mrb[0].mxu1 %v521_v62 }
 0x24d   :  { %v301_v0 = vpop.f32.mrb[0].mxu1 }
 0x24e   :  { %v302_v1 = vadd.f32 %v337_v63, %v301_v0  ;;  %v441_v2 = vpop.f32.mrb[1].mxu1 }
 0x250   :  { %305 = vst [vmem:[#allocation13] sm:$0xff] %v302_v1 }
 0x251   :  { %633 = shalt.err (!%p630_p3)
}
 0x252   :  { %s634_s29 = scalar_lea.hbm %s835_s8, 128 }
 0x253   :  { %p635_p4 = scmp.ne.s32.totalorder %s835_s8, %s634_s29  ;;  %p638_p5 = scmp.lt.u32.totalorder %s634_s29, %s835_s8 }
 0x255   :  { %p640_p6 = pnand %p638_p5, %p635_p4 }
 0x257   :  { %643 = shalt.err (!%p640_p6)
}
 0x258   :  { %315 = dma.vmem_to_hbm [thread:$0]  %s313_s26, 128, %s835_s8, [#allocation9]  }
 0x259   :  { %658 = dma.done.wait [#allocation9], 128  }
 0x25a   :  { %659 = vsyncadd [#allocation9], 4294967168 }
 0x25b   :  { %319 = vsyncpa [#allocation8], 1 }
 0x25c   :  { %320 = vsyncpa [#allocation11], 1 }
 0x25d   :  { %321 = vsyncpa [#allocation9], 1 }

</bundles_post_ra>
